<compile_context>
chip_gen: v7x
topology: tpu7x:2x2x1
jax: 0.10.0
libtpu: 0.0.40
codegen_flags: <defaults>
</compile_context>

<pallas_src>
import functools
import math

import jax
import jax.numpy as jnp
from jax.experimental import pallas as pl
from jax.experimental.pallas import tpu as pltpu

LANE = 128       # TPU vreg lane width
SUBLANE = 8      # TPU vreg sublane width (f32)
_L_TILE_CAP = 512  # max conv output rows per grid step


def _round_up(x, m):
    return (x + m - 1) // m * m


# ----------------------------------------------------------------------------
# Per-generation VMEM budget (v5e/v6e: 128 MiB physical, v7x: 64 MiB)
# ----------------------------------------------------------------------------
def _detect_tpu():
    kind = ""
    try:
        kind = jax.devices()[0].device_kind.lower()
    except Exception:
        pass
    vmem = None
    try:
        vmem = int(getattr(pltpu.get_tpu_info(), "vmem_capacity_bytes"))
    except Exception:
        vmem = None
    if vmem is None:
        vmem = (64 if "7" in kind else 128) * 2**20
    return kind, vmem


_TPU_KIND, _VMEM_PHYS = _detect_tpu()
_IS_V7X = "7" in _TPU_KIND                       # 2 TensorCores, 64 MiB VMEM
if _VMEM_PHYS >= 100 * 2**20:                    # v5e / v6e
    _VMEM_BUDGET, _VMEM_LIMIT = 48 * 2**20, 64 * 2**20
else:                                            # v7x (or unknown / small VMEM)
    _VMEM_BUDGET, _VMEM_LIMIT = 22 * 2**20, 32 * 2**20


def _apply_act(y, activation):
    if activation is None:
        return y
    if activation == "ReLU":
        return jnp.maximum(y, 0.0)
    if activation == "Tanh":
        return jnp.tanh(y)
    if activation == "Sigmoid":
        return jax.nn.sigmoid(y)
    if activation == "GELU":
        return jax.nn.gelu(y)
    # TODO(synk): other torch.nn activations (e.g. Softmax with out_act_opts) not wired up.
    raise NotImplementedError(f"activation {activation}")


# ----------------------------------------------------------------------------
# Fused linear kernel:  o = act(x @ w + b)   (bf16 MXU, f32 accumulation)
# ----------------------------------------------------------------------------
def _linear_act_kernel(x_ref, w_ref, b_ref, o_ref, *, activation):
    y = jnp.dot(x_ref[...].astype(jnp.bfloat16), w_ref[...],
                preferred_element_type=jnp.float32)
    y = _apply_act(y + b_ref[...], activation)
    o_ref[...] = y.astype(o_ref.dtype)


_TM_CANDIDATES = (1024, 512, 256, 128, 64, 32, 16, 8)


def _plan_linear_tiles(m, layer_dims, budget):
    """Return (m_pad, [(tm, tn) per layer]) so M is padded once for the whole chain."""
    m8 = _round_up(max(m, 1), SUBLANE)
    plans = []
    for k_pad, n_pad in layer_dims:
        w_db_bytes = 2 * 2 * k_pad * n_pad          # bf16 weight, double-buffered
        if w_db_bytes <= budget // 2 or n_pad <= 256:
            tn = n_pad                               # fully resident weight
        elif n_pad % 256 == 0:
            tn = 256                                 # match v6e/v7x 256-wide MXU
        else:
            tn = 128
        # TODO(synk): layers with enormous K would also need K tiling + accumulator.
        tm = SUBLANE
        for cand in _TM_CANDIDATES:
            if cand > m8:
                continue
            need = (4 * 2 * cand * k_pad        # f32 x tiles (double-buffered)
                    + 4 * 2 * cand * tn         # f32 out tiles (double-buffered)
                    + 2 * 2 * k_pad * tn        # bf16 weight (double-buffered)
                    + 4 * 2 * tn)               # f32 bias
            if need <= budget:
                tm = cand
                break
        plans.append([tm, tn, n_pad])
    tm_max = max(p[0] for p in plans)
    m_pad = _round_up(m8, tm_max)
    if _IS_V7X:
        # Only v7x has 2 TensorCores: make sure each layer's grid has >= 2 steps.
        for p in plans:
            tm, tn, n_pad = p
            if (m_pad // tm) * (n_pad // tn) < 2 and tm > SUBLANE:
                p[0] = tm // 2
    return m_pad, [(p[0], p[1]) for p in plans]


def pallas_linear(x, w_bf, b_row, tm, tn, activation=None):
    """x: (M_pad, K_pad) f32; w_bf: (K_pad, N_pad) bf16 pre-transposed+padded; b_row: (1, N_pad) f32."""
    m_pad, k_pad = x.shape
    k_pad_w, n_pad = w_bf.shape
    assert k_pad == k_pad_w and m_pad % tm == 0 and n_pad % tn == 0

    flops = 2 * m_pad * k_pad * n_pad
    transcendentals = m_pad * n_pad if activation == "Tanh" else 0
    bytes_accessed = (4 * m_pad * k_pad + 2 * k_pad * n_pad + 4 * n_pad
                      + 4 * m_pad * n_pad)

    return pl.pallas_call(
        functools.partial(_linear_act_kernel, activation=activation),
        out_shape=jax.ShapeDtypeStruct((m_pad, n_pad), jnp.float32),
        grid=(m_pad // tm, n_pad // tn),
        in_specs=[
            pl.BlockSpec((tm, k_pad), lambda i, j: (i, 0)),     # activations
            pl.BlockSpec((k_pad, tn), lambda i, j: (0, j)),     # bf16 weight
            pl.BlockSpec((1, tn), lambda i, j: (0, j)),         # bias
        ],
        out_specs=pl.BlockSpec((tm, tn), lambda i, j: (i, j)),
        compiler_params=pltpu.CompilerParams(
            dimension_semantics=("parallel", "parallel"),
            vmem_limit_bytes=_VMEM_LIMIT,
        ),
        cost_estimate=pl.CostEstimate(
            flops=flops, transcendentals=transcendentals, bytes_accessed=bytes_accessed),
    )(x, w_bf, b_row)


# ----------------------------------------------------------------------------
# Fused conv kernel: VALID stride-1 Conv2d + bias + act on a flattened (H*W, C)
# buffer.  No HBM im2col, no channel padding; the window gather is kh*kw shifted
# contiguous-slab matmuls on VMEM refs.  Channels stay at their real extent.
# ----------------------------------------------------------------------------
def _conv_act_kernel(x_ref, w_ref, b_ref, o_ref, *, kh, kw, w_img, multi_tile, activation):
    # x_ref: (1, hw_need, cin) flattened image (+ zero pad rows), f32
    # w_ref: (kh*kw, cin, cout) bf16;  b_ref: (1, cout) f32
    # o_ref: (1, tl, cout) rows map to (y, x) via y*w_img + x
    tl = o_ref.shape[1]
    if multi_tile:
        base = pl.multiple_of(pl.program_id(1) * tl, tl)
    else:
        base = 0
    acc = None
    for i in range(kh):                                    # static taps -> static slices
        for j in range(kw):
            piece = x_ref[0, pl.ds(base + i * w_img + j, tl), :].astype(jnp.bfloat16)
            contrib = jnp.dot(piece, w_ref[i * kw + j],
                              preferred_element_type=jnp.float32)
            acc = contrib if acc is None else acc + contrib
    acc = _apply_act(acc + b_ref[...], activation)
    o_ref[0] = acc.astype(o_ref.dtype)


def pallas_conv2d_flat(x_flat, w_img, ho, kh, kw, w_taps, b_row, activation=None):
    """x_flat: (N, rows, Cin) flattened image buffer (rows indexed by y*w_img + x).
    w_taps: (kh*kw, Cin, Cout) bf16;  b_row: (1, Cout) f32.
    Returns (N, l_out, Cout) flattened output buffer (rows y*w_img + x; only
    y < ho and x < valid width are meaningful)."""
    n, rows_in, cin = x_flat.shape
    taps, cin_w, cout = w_taps.shape
    assert taps == kh * kw and cin_w == cin

    l_rows = ho * w_img
    if l_rows <= _L_TILE_CAP:
        tl, n_lt = _round_up(l_rows, SUBLANE), 1
    else:
        tl = _L_TILE_CAP
        n_lt = -(-l_rows // tl)
    l_out = tl * n_lt
    hw_need = _round_up(l_out + (kh - 1) * w_img + (kw - 1), SUBLANE)
    if rows_in < hw_need:
        x_flat = jnp.pad(x_flat, ((0, 0), (0, hw_need - rows_in), (0, 0)))

    flops = 2 * n * taps * l_out * cin * cout
    transcendentals = n * l_out * cout if activation == "Tanh" else 0
    bytes_accessed = (4 * n * hw_need * cin + 2 * w_taps.size + 4 * b_row.size
                      + 4 * n * l_out * cout)

    return pl.pallas_call(
        functools.partial(_conv_act_kernel, kh=kh, kw=kw, w_img=w_img,
                          multi_tile=(n_lt > 1), activation=activation),
        out_shape=jax.ShapeDtypeStruct((n, l_out, cout), jnp.float32),
        grid=(n, n_lt),
        in_specs=[
            pl.BlockSpec((1, hw_need, cin), lambda b, l: (b, 0, 0)),      # image b (resident over l)
            pl.BlockSpec((taps, cin, cout), lambda b, l: (0, 0, 0)),      # bf16 weights
            pl.BlockSpec((1, cout), lambda b, l: (0, 0)),                 # bias
        ],
        out_specs=pl.BlockSpec((1, tl, cout), lambda b, l: (b, l, 0)),
        compiler_params=pltpu.CompilerParams(
            dimension_semantics=("parallel", "parallel"),
            vmem_limit_bytes=_VMEM_LIMIT,
        ),
        cost_estimate=pl.CostEstimate(
            flops=flops, transcendentals=transcendentals, bytes_accessed=bytes_accessed),
    )(x_flat, w_taps, b_row)


# ----------------------------------------------------------------------------
# Encoder: cascade of Conv2d or Linear layers (mirrors the PyTorch module)
# ----------------------------------------------------------------------------
class Encoder:
    # TODO(synk): layer_opts (conv stride/padding/etc.) and out_act_opts (Softmax dim)
    # from the PyTorch module are not wired up.
    def __init__(self, obs_raw, layers=((115, 256),), act=None, out_act=True, key=None):
        assert len(layers), "Incorrect configuration of encoder layers!"
        self.obs_raw = obs_raw
        # Resolve activations exactly like the PyTorch module.
        self.act = act
        if isinstance(out_act, str):
            self.out_act = out_act
        elif out_act:
            self.out_act = act
        else:
            self.out_act = None

        if key is None:
            key = jax.random.PRNGKey(0)

        self.torch_params = []   # (w, b) in PyTorch layout, f32, for the reference path
        self.kernel_params = []  # bf16 / pre-transposed tensors for the Pallas path
        for spec in layers:
            key, wk, bk = jax.random.split(key, 3)
            if obs_raw:
                cin, cout, (kh, kw) = spec
                fan_in = cin * kh * kw
                bound = 1.0 / math.sqrt(fan_in)
                w = jax.random.uniform(wk, (cout, cin, kh, kw), jnp.float32, -bound, bound)
                b = jax.random.uniform(bk, (cout,), jnp.float32, -bound, bound)
                # (Cout,Cin,kh,kw) -> (kh*kw, Cin, Cout), bf16, no channel padding.
                w_taps = jnp.transpose(w, (2, 3, 1, 0)).reshape(kh * kw, cin, cout)
                self.kernel_params.append(dict(
                    w_taps=w_taps.astype(jnp.bfloat16),
                    b_row=b.reshape(1, cout),
                    kh=kh, kw=kw, cin=cin, cout=cout))
            else:
                cin, cout = spec
                bound = 1.0 / math.sqrt(cin)
                w = jax.random.uniform(wk, (cout, cin), jnp.float32, -bound, bound)
                b = jax.random.uniform(bk, (cout,), jnp.float32, -bound, bound)
                k_pad, n_pad = _round_up(cin, LANE), _round_up(cout, LANE)
                # Pre-transpose + zero-pad + bf16 cast once at init.
                w_t = jnp.zeros((k_pad, n_pad), jnp.float32).at[:cin, :cout].set(w.T)
                b_row = jnp.zeros((1, n_pad), jnp.float32).at[0, :cout].set(b)
                self.kernel_params.append(dict(
                    w_t=w_t.astype(jnp.bfloat16), b_row=b_row, cin=cin, cout=cout))
            self.torch_params.append((w, b))

    def _act_for(self, i):
        return self.act if i + 1 < len(self.kernel_params) else self.out_act

    def __call__(self, x):
        """Encoder inference (Pallas hot path)."""
        if self.obs_raw:
            n, c, h, w_img = x.shape
            assert c == self.kernel_params[0]["cin"]
            # Single NCHW -> NHWC conversion + flatten H*W; channels stay unpadded.
            xf = jnp.transpose(x, (0, 2, 3, 1)).reshape(n, h * w_img, c)
            cur_h, cur_wo = h, w_img
            for i, p in enumerate(self.kernel_params):
                kh, kw = p["kh"], p["kw"]
                cur_h = cur_h - kh + 1
                cur_wo = cur_wo - kw + 1
                xf = pallas_conv2d_flat(xf, w_img, cur_h, kh, kw,
                                        p["w_taps"], p["b_row"], self._act_for(i))
            cout = self.kernel_params[-1]["cout"]
            # Single final extraction: rows y < cur_h, columns x < cur_wo.
            out = xf[:, :cur_h * w_img, :].reshape(n, cur_h, w_img, cout)[:, :, :cur_wo, :]
            return jnp.transpose(out, (0, 3, 1, 2))     # back to NCHW (once)
        else:
            m, k = x.shape
            k_pad0 = self.kernel_params[0]["w_t"].shape[0]
            layer_dims = [p["w_t"].shape for p in self.kernel_params]
            m_pad, plans = _plan_linear_tiles(m, layer_dims, _VMEM_BUDGET)
            if m_pad != m or k_pad0 != k:
                x = jnp.pad(x, ((0, m_pad - m), (0, k_pad0 - k)))   # pad once
            for i, (p, (tm, tn)) in enumerate(zip(self.kernel_params, plans)):
                x = pallas_linear(x, p["w_t"], p["b_row"], tm, tn, self._act_for(i))
            return x[:m, :self.kernel_params[-1]["cout"]]           # slice once

    def reference(self, x):
        """Pure-JAX f32 reference for correctness checking."""
        for i, (w, b) in enumerate(self.torch_params):
            a = self._act_for(i)
            if self.obs_raw:
                x = jax.lax.conv_general_dilated(
                    x, w, (1, 1), "VALID",
                    dimension_numbers=("NCHW", "OIHW", "NCHW"),
                ) + b[None, :, None, None]
            else:
                x = x @ w.T + b
            if a is not None:
                x = _apply_act(x, a)
        return x


if __name__ == "__main__":
    root = jax.random.PRNGKey(0)
    k_vec, k_img, k_enc1, k_enc2 = jax.random.split(root, 4)

    # 1) Default config: obs_raw=False, layers=[(115, 256)], act=None, out_act=True
    #    (out_act resolves to act == None, i.e. a single plain Linear).
    x_vec = jax.random.normal(k_vec, (8, 115), jnp.float32)
    enc_lin = Encoder(obs_raw=False, layers=[(115, 256)], act=None, out_act=True, key=k_enc1)
    y_lin = jax.block_until_ready(jax.jit(enc_lin.__call__)(x_vec))
    y_lin_ref = enc_lin.reference(x_vec)
    assert y_lin.shape == (8, 256)
    assert jnp.allclose(y_lin, y_lin_ref, rtol=2e-2, atol=2e-2), \
        float(jnp.max(jnp.abs(y_lin - y_lin_ref)))

    # 2) CNN config: obs_raw=True, two Conv2d layers with ReLU everywhere.
    x_img = jax.random.normal(k_img, (2, 4, 16, 16), jnp.float32)   # NCHW
    enc_cnn = Encoder(
        obs_raw=True,
        layers=[(4, 8, (3, 3)), (8, 16, (3, 3))],
        act="ReLU",
        out_act=True,
        key=k_enc2,
    )
    y_cnn = jax.block_until_ready(jax.jit(enc_cnn.__call__)(x_img))
    y_cnn_ref = enc_cnn.reference(x_img)
    assert y_cnn.shape == (2, 16, 12, 12)
    assert jnp.allclose(y_cnn, y_cnn_ref, rtol=2e-2, atol=2e-2), \
        float(jnp.max(jnp.abs(y_cnn - y_cnn_ref)))

    print("KERNEL_OK")
</pallas_src>

<mosaic_0001>
module attributes {stable_mosaic.version = 11 : i64} {
  func.func @_linear_act_kernel(%arg0: i32, %arg1: i32, %arg2: memref<8x128xf32, #tpu.memory_space<vmem>>, %arg3: memref<128x256xbf16, #tpu.memory_space<vmem>>, %arg4: memref<1x256xf32, #tpu.memory_space<vmem>>, %arg5: memref<8x256xf32, #tpu.memory_space<vmem>>) attributes {dimension_semantics = [#tpu.dimension_semantics<parallel>, #tpu.dimension_semantics<parallel>], iteration_bounds = array<i64: 1, 1>, scalar_prefetch = 0 : i64, scratch_operands = 0 : i64, tpu.core_type = #tpu.core_type<tc>, window_params = [{transform_indices = @transform_0, window_bounds = array<i64: 8, 128>}, {transform_indices = @transform_1, window_bounds = array<i64: 128, 256>}, {transform_indices = @transform_2, window_bounds = array<i64: 1, 256>}, {transform_indices = @transform_3, window_bounds = array<i64: 8, 256>}]} {
    %c0 = arith.constant 0 : index
    %c0_0 = arith.constant 0 : index
    %0 = vector.load %arg2[%c0, %c0_0] : memref<8x128xf32, #tpu.memory_space<vmem>>, vector<8x128xf32>
    %1 = arith.truncf %0 : vector<8x128xf32> to vector<8x128xbf16>
    %c0_1 = arith.constant 0 : index
    %c0_2 = arith.constant 0 : index
    %2 = vector.load %arg3[%c0_1, %c0_2] : memref<128x256xbf16, #tpu.memory_space<vmem>>, vector<128x256xbf16>
    %cst = arith.constant dense<0.000000e+00> : vector<8x256xf32>
    %3 = tpu.matmul %1, %2, %cst {dimension_numbers = #tpu.dot_dimension_numbers<[1], [0], [0], [1], [0, 0, 1, 1], [], []>} : vector<8x128xbf16>, vector<128x256xbf16>, vector<8x256xf32> -> vector<8x256xf32>
    %c0_3 = arith.constant 0 : index
    %c0_4 = arith.constant 0 : index
    %4 = vector.load %arg4[%c0_3, %c0_4] : memref<1x256xf32, #tpu.memory_space<vmem>>, vector<1x256xf32>
    %5 = vector.broadcast %4 : vector<1x256xf32> to vector<8x256xf32>
    %6 = arith.addf %3, %5 : vector<8x256xf32>
    %c0_5 = arith.constant 0 : index
    %c0_6 = arith.constant 0 : index
    %7 = vector.load %arg5[%c0_5, %c0_6] : memref<8x256xf32, #tpu.memory_space<vmem>>, vector<8x256xf32>
    tpu.vector_store %arg5[%c0_5, %c0_6], %6 {strides = array<i32>} : memref<8x256xf32, #tpu.memory_space<vmem>>, vector<8x256xf32>,
    return
  }
  func.func @transform_0(%arg0: i32, %arg1: i32) -> (i32, i32) {
    %c0_i32 = arith.constant 0 : i32
    %c0_i32_0 = arith.constant 0 : i32
    return %arg0, %c0_i32 : i32, i32
  }
  func.func @transform_1(%arg0: i32, %arg1: i32) -> (i32, i32) {
    %c0_i32 = arith.constant 0 : i32
    %c0_i32_0 = arith.constant 0 : i32
    return %c0_i32, %arg1 : i32, i32
  }
  func.func @transform_2(%arg0: i32, %arg1: i32) -> (i32, i32) {
    %c0_i32 = arith.constant 0 : i32
    %c0_i32_0 = arith.constant 0 : i32
    return %c0_i32, %arg1 : i32, i32
  }
  func.func @transform_3(%arg0: i32, %arg1: i32) -> (i32, i32) {
    %c0_i32 = arith.constant 0 : i32
    return %arg0, %arg1 : i32, i32
  }
}

</mosaic_0001>

<bundles_post_ra>
// kernel: a_call__.1
= control target key start
LH: loop header
LB: loop body
LE: loop exit
PB: predicated region body
PF: predicated region fallthrough
CT: control target
= control target key end

     0   :  { %8 = vsyncpa [#allocation3], 0  ;;  %s438_s0 = inlined_call_operand.hbm [shape: f32[8,128], index: 0, kind: input, shape index: {}]   ;;  %s439_s1 = inlined_call_operand.hbm [shape: bf16[128,256], index: 1, kind: input, shape index: {}]   ;;  %s440_s2 = inlined_call_operand.hbm [shape: f32[1,256], index: 2, kind: input, shape index: {}]   ;;  %s441_s3 = inlined_call_operand.hbm [shape: f32[8,256], index: 3, kind: output, shape index: {}]  }
   0x1   :  { %9 = vsyncpa [#allocation6], 0 }
   0x2   :  { %10 = vsyncpa [#allocation4], 0  ;;  %s363_s12 = smov [#allocation5]   ;;  %s269_s16 = scalar_lea.hbm %s439_s1, 2048 }
   0x3   :  { %s26_s13 = sshll.u32 %s363_s12, 4  ;;  %p270_p0 = scmp.ne.s32.totalorder %s439_s1, %s269_s16  ;;  %s27_s13 = int_to_ptr.vmem [resolvable:$true] %s26_s13 }
   0x4   :  { %p273_p1 = scmp.lt.u32.totalorder %s269_s16, %s439_s1 }
   0x6   :  { %p275_p2 = pnand %p273_p1, %p270_p0 }
   0x8   :  { %278 = shalt.err (!%p275_p2)
}
   0x9   :  { %s279_s21 = scalar_lea.vmem %s27_s13, 2048  ;;  %p284_p4 = scmp.lt.s32.totalorder %s27_s13, %s27_s13 }
   0xa   :  { %p280_p3 = scmp.ne.s32.totalorder %s27_s13, %s279_s21  ;;  %p285_p5 = scmp.lt.s32.totalorder %s279_s21, %s279_s21 }
   0xc   :  { %p286_p6 = por %p285_p5, %p284_p4 }
   0xe   :  { %p287_p7 = pnand %p286_p6, %p280_p3 }
  0x10   :  { %290 = shalt.err (!%p287_p7)
}
  0x11   :  { %s364_s22 = smov 128   ;;  %s365_s23 = smov 8  }
  0x12   :  { %32 = dma.hbm_to_vmem [thread:$0]  %s439_s1, 2048, %s27_s13, [#allocation6], %s364_s22, %s364_s22, %s365_s23  }
  0x13   :  { %s366_s26 = smov [#allocation2]   ;;  %s367_s28 = smov [#allocation7]  }
  0x14   :  { %s17_s27 = sshll.u32 %s366_s26, 4  ;;  %s39_s29 = sshll.u32 %s367_s28, 4  ;;  %s18_s27 = int_to_ptr.vmem [resolvable:$true] %s17_s27  ;;  %s40_s29 = int_to_ptr.vmem [resolvable:$true] %s39_s29 }
  0x15   :  { %s291_s5 = scalar_lea.hbm %s438_s0, 128 }
  0x16   :  { %p292_p8 = scmp.ne.s32.totalorder %s438_s0, %s291_s5  ;;  %p295_p9 = scmp.lt.u32.totalorder %s291_s5, %s438_s0 }
  0x18   :  { %p297_p10 = pnand %p295_p9, %p292_p8 }
  0x1a   :  { %300 = shalt.err (!%p297_p10)
}
  0x1b   :  { %s301_s1 = scalar_lea.vmem %s18_s27, 128  ;;  %p306_p12 = scmp.lt.s32.totalorder %s18_s27, %s18_s27 }
  0x1c   :  { %p302_p11 = scmp.ne.s32.totalorder %s18_s27, %s301_s1  ;;  %p307_p13 = scmp.lt.s32.totalorder %s301_s1, %s301_s1 }
  0x1e   :  { %p308_p0 = por %p307_p13, %p306_p12 }
  0x20   :  { %p309_p1 = pnand %p308_p0, %p302_p11 }
  0x22   :  { %312 = shalt.err (!%p309_p1)
}
  0x23   :  { %20 = dma.hbm_to_vmem [thread:$0]  %s438_s0, 128, %s18_s27, [#allocation3]  }
  0x24   :  { %s313_s14 = scalar_lea.hbm %s440_s2, 32 }
  0x25   :  { %p314_p2 = scmp.ne.s32.totalorder %s440_s2, %s313_s14  ;;  %p317_p3 = scmp.lt.u32.totalorder %s313_s14, %s440_s2 }
  0x27   :  { %p319_p4 = pnand %p317_p3, %p314_p2 }
  0x29   :  { %322 = shalt.err (!%p319_p4)
}
  0x2a   :  { %s323_s19 = scalar_lea.vmem %s40_s29, 32  ;;  %p328_p6 = scmp.lt.s32.totalorder %s40_s29, %s40_s29 }
  0x2b   :  { %p324_p5 = scmp.ne.s32.totalorder %s40_s29, %s323_s19  ;;  %p329_p7 = scmp.lt.s32.totalorder %s323_s19, %s323_s19 }
  0x2d   :  { %p330_p8 = por %p329_p7, %p328_p6 }
  0x2f   :  { %p331_p9 = pnand %p330_p8, %p324_p5 }
  0x31   :  { %334 = shalt.err (!%p331_p9)
}
  0x32   :  { %42 = dma.hbm_to_vmem [thread:$0]  %s440_s2, 32, %s40_s29, [#allocation6]  }
  0x33   :  { %357 = dma.done.wait [#allocation3], 128  }
  0x34   :  { %358 = vsyncadd [#allocation3], 4294967168 }
  0x35   :  { %359 = dma.done.wait [#allocation6], 2080  }
  0x36   :  { %360 = vsyncadd [#allocation6], 4294965216  ;;  %v368_v0 = vmov 0   ;;  %v245_v1 = vld [vmem:[#allocation5 + $0x4] ss:$8 sps:$4 sm:$0xff]   ;;  %v53_v17 = vld [vmem:[#allocation2] sm:$0xff]  ;;  %v73_v19 = vlaneseq }
  0x37   :  { %195 = vmatprep.mubr.bf16.mxu0 %v368_v0  ;;  %v247_v2 = vld [vmem:[#allocation5] ss:$8 sps:$4 sm:$0xff]   ;;  %163 = vmatprep.subr.bf16.mxu0 %v245_v1  ;;  %v248_v3 = vld [vmem:[#allocation5 + $0x14] ss:$8 sps:$4 sm:$0xff]   ;;  %v250_v4 = vld [vmem:[#allocation5 + $0x10] ss:$8 sps:$4 sm:$0xff]   ;;  %v54_v18 = vpack.c.bf16 %v53_v17, %v53_v17 }
  0x38   :  { %164 = vmatpush1.bf16.msra.mxu0 %v247_v2  ;;  %v251_v5 = vld [vmem:[#allocation5 + $0x24] ss:$8 sps:$4 sm:$0xff]   ;;  %v253_v6 = vld [vmem:[#allocation5 + $0x20] ss:$8 sps:$4 sm:$0xff]   ;;  %v254_v7 = vld [vmem:[#allocation5 + $0x34] ss:$8 sps:$4 sm:$0xff]  }
  0x39   :  { %165 = vmatprep.subr.bf16.mxu0 %v248_v3  ;;  %v256_v8 = vld [vmem:[#allocation5 + $0x30] ss:$8 sps:$4 sm:$0xff]   ;;  %v257_v9 = vld [vmem:[#allocation5 + $0x44] ss:$8 sps:$4 sm:$0xff]   ;;  %v259_v10 = vld [vmem:[#allocation5 + $0x40] ss:$8 sps:$4 sm:$0xff]  }
  0x3a   :  { %v260_v11 = vld [vmem:[#allocation5 + $0x54] ss:$8 sps:$4 sm:$0xff]   ;;  %v262_v12 = vld [vmem:[#allocation5 + $0x50] ss:$8 sps:$4 sm:$0xff]   ;;  %v263_v13 = vld [vmem:[#allocation5 + $0x64] ss:$8 sps:$4 sm:$0xff]  }
  0x3b   :  { %v265_v14 = vld [vmem:[#allocation5 + $0x60] ss:$8 sps:$4 sm:$0xff]   ;;  %v266_v15 = vld [vmem:[#allocation5 + $0x74] ss:$8 sps:$4 sm:$0xff]   ;;  %v268_v16 = vld [vmem:[#allocation5 + $0x70] ss:$8 sps:$4 sm:$0xff]  }
  0x3c   :  { %166 = vmatpush1.bf16.msra.mxu0 %v250_v4  ;;  %v74_v20 = vshrl.u32 %v73_v19, 7  ;;  %v71_v22 = vld [vmem:[#allocation7] sm:$0x3]  ;;  %s369_s2 = smov [#allocation8]  }
  0x3d   :  { %167 = vmatprep.subr.bf16.mxu0 %v251_v5  ;;  %s212_s21 = sshll.u32 %s369_s2, 4  ;;  %s213_s21 = int_to_ptr.vmem [resolvable:$true] %s212_s21 }
  0x3e   :  { %v75_v21 = vsub.s32 0, %v74_v20  ;;  %v79_v23 = vsub.s32 1, %v74_v20  ;;  %s335_s22 = scalar_lea.vmem %s213_s21, 256  ;;  %p340_p11 = scmp.lt.s32.totalorder %s213_s21, %s213_s21 }
  0x3f   :  { %p336_p10 = scmp.ne.s32.totalorder %s213_s21, %s335_s22  ;;  %p341_p12 = scmp.lt.s32.totalorder %s335_s22, %s335_s22 }
  0x40   :  { %168 = vmatpush1.bf16.msra.mxu0 %v253_v6  ;;  %v76_v24 = vrot.slane %v71_v22, %v75_v21  ;;  %v80_v25 = vrot.slane %v71_v22, %v79_v23 }
  0x41   :  { %169 = vmatprep.subr.bf16.mxu0 %v254_v7  ;;  %p342_p13 = por %p341_p12, %p340_p11 }
  0x43   :  { %p343_p0 = pnand %p342_p13, %p336_p10 }
  0x44   :  { %170 = vmatpush1.bf16.msra.mxu0 %v256_v8 }
  0x45   :  { %171 = vmatprep.subr.bf16.mxu0 %v257_v9 }
  0x48   :  { %172 = vmatpush1.bf16.msra.mxu0 %v259_v10 }
  0x49   :  { %173 = vmatprep.subr.bf16.mxu0 %v260_v11 }
  0x4c   :  { %174 = vmatpush1.bf16.msra.mxu0 %v262_v12 }
  0x4d   :  { %175 = vmatprep.subr.bf16.mxu0 %v263_v13 }
  0x50   :  { %176 = vmatpush1.bf16.msra.mxu0 %v265_v14 }
  0x51   :  { %177 = vmatprep.subr.bf16.mxu0 %v266_v15 }
  0x54   :  { %178 = vmatpush1.bf16.msra.mxu0 %v268_v16 }
  0x57   :  { %196 = vmatmul.mubr.bf16.vlgmr.msra.gmra.mrb[0].mxu0 %v54_v18 }
 0x12a   :  { %v197_v26 = vpop.f32.mrb[0].mxu0 }
 0x12b   :  { %v198_v27 = vadd.f32 %v197_v26, %v76_v24  ;;  %v199_v28 = vpop.f32.mrb[1].mxu0 }
 0x12c   :  { %v200_v29 = vadd.f32 %v199_v28, %v80_v25  ;;  %v201_v30 = vpop.f32.mrb[2].mxu0 }
 0x12d   :  { %204 = vst [vmem:[#allocation8] sm:$0xff] %v198_v27  ;;  %v202_v31 = vpop.f32.mrb[3].mxu0 }
 0x12e   :  { %205 = vst [vmem:[#allocation8 + $0x8] sm:$0xff] %v200_v29 }
 0x12f   :  { %346 = shalt.err (!%p343_p0)
}
 0x130   :  { %s347_s25 = scalar_lea.hbm %s441_s3, 256 }
 0x131   :  { %p348_p1 = scmp.ne.s32.totalorder %s441_s3, %s347_s25  ;;  %p351_p2 = scmp.lt.u32.totalorder %s347_s25, %s441_s3 }
 0x133   :  { %p353_p3 = pnand %p351_p2, %p348_p1 }
 0x135   :  { %356 = shalt.err (!%p353_p3)
}
 0x136   :  { %215 = dma.vmem_to_hbm [thread:$0]  %s213_s21, 256, %s441_s3, [#allocation4]  }
 0x137   :  { %361 = dma.done.wait [#allocation4], 256  }
 0x138   :  { %362 = vsyncadd [#allocation4], 4294967040 }
 0x139   :  { %219 = vsyncpa [#allocation3], 1 }
 0x13a   :  { %220 = vsyncpa [#allocation6], 1 }
 0x13b   :  { %221 = vsyncpa [#allocation4], 1 }

</bundles_post_ra>
